<compile_context>
chip_gen: v7x
topology: tpu7x:2x2x1
jax: 0.10.0
libtpu: 0.0.40
codegen_flags: <defaults>
</compile_context>

<pallas_src>
import functools

import jax
import jax.numpy as jnp
from jax import lax
from jax.experimental import pallas as pl
from jax.experimental.pallas import tpu as pltpu


def _round_up(x, m):
    return ((x + m - 1) // m) * m


# ----------------------------- Pallas kernels ------------------------------ #

def _make_kernel(apply_relu: bool, has_residual: bool):
    """Tiled matmul + bias (+ residual add) (+ ReLU), f32 VMEM accumulator."""

    def _epilogue(acc, b_ref, r_ref, o_ref):
        y = acc + b_ref[...]                       # bias broadcast (1, tn)
        if r_ref is not None:
            y = y + r_ref[...].astype(jnp.float32)  # residual add in f32
        if apply_relu:
            y = jnp.maximum(y, 0.0)
        o_ref[...] = y.astype(o_ref.dtype)

    if has_residual:
        def kernel(p_ref, w_ref, b_ref, r_ref, o_ref, acc_ref):
            k = pl.program_id(2)

            @pl.when(k == 0)
            def _():
                acc_ref[...] = jnp.zeros_like(acc_ref)

            acc_ref[...] += jnp.dot(p_ref[...], w_ref[...],
                                    preferred_element_type=jnp.float32)

            @pl.when(k == pl.num_programs(2) - 1)
            def _():
                _epilogue(acc_ref[...], b_ref, r_ref, o_ref)
    else:
        def kernel(p_ref, w_ref, b_ref, o_ref, acc_ref):
            k = pl.program_id(2)

            @pl.when(k == 0)
            def _():
                acc_ref[...] = jnp.zeros_like(acc_ref)

            acc_ref[...] += jnp.dot(p_ref[...], w_ref[...],
                                    preferred_element_type=jnp.float32)

            @pl.when(k == pl.num_programs(2) - 1)
            def _():
                _epilogue(acc_ref[...], b_ref, None, o_ref)

    return kernel


def _fused_matmul_bias(patches, w2d, bias, residual=None, relu=False,
                       out_dtype=jnp.float32):
    """relu?(patches @ w2d + bias (+ residual)) with a tiled Pallas matmul."""
    M, K = patches.shape
    Cout = w2d.shape[1]

    # Tile sizes: lane-dense (multiples of 128 on the last dim), (8,128)-aligned,
    # small enough to double-buffer comfortably inside v7x's 64 MiB VMEM.
    tm = min(512, _round_up(M, 8))
    tn = min(256, _round_up(Cout, 128))
    tk = min(256, _round_up(K, 128))
    Mp, Kp, Cp = _round_up(M, tm), _round_up(K, tk), _round_up(Cout, tn)

    # Zero-pad to tile multiples; padded K rows of w are zero so the reduction
    # is unaffected, padded M rows / Cout cols are sliced off afterwards.
    p = jnp.pad(patches, ((0, Mp - M), (0, Kp - K))).astype(jnp.bfloat16)
    w = jnp.pad(w2d, ((0, Kp - K), (0, Cp - Cout))).astype(jnp.bfloat16)
    b = jnp.pad(bias.reshape(1, Cout).astype(jnp.float32),
                ((0, 0), (0, Cp - Cout)))

    inputs = [p, w, b]
    in_specs = [
        pl.BlockSpec((tm, tk), lambda i, j, k: (i, k)),
        pl.BlockSpec((tk, tn), lambda i, j, k: (k, j)),
        pl.BlockSpec((1, tn), lambda i, j, k: (0, j)),
    ]
    r_bytes = 0
    if residual is not None:
        r = jnp.pad(residual.astype(jnp.float32),
                    ((0, Mp - M), (0, Cp - Cout)))
        inputs.append(r)
        in_specs.append(pl.BlockSpec((tm, tn), lambda i, j, k: (i, j)))
        r_bytes = r.size * 4

    kernel = _make_kernel(apply_relu=relu, has_residual=residual is not None)

    cost = pl.CostEstimate(
        flops=2 * Mp * Kp * Cp,
        transcendentals=0,
        bytes_accessed=(p.size * 2 + w.size * 2 + b.size * 4 + r_bytes
                        + Mp * Cp * jnp.dtype(out_dtype).itemsize),
    )

    out = pl.pallas_call(
        kernel,
        grid_spec=pltpu.PrefetchScalarGridSpec(
            num_scalar_prefetch=0,
            grid=(Mp // tm, Cp // tn, Kp // tk),
            in_specs=in_specs,
            out_specs=pl.BlockSpec((tm, tn), lambda i, j, k: (i, j)),
            scratch_shapes=[pltpu.VMEM((tm, tn), jnp.float32)],
        ),
        out_shape=jax.ShapeDtypeStruct((Mp, Cp), out_dtype),
        compiler_params=pltpu.CompilerParams(
            dimension_semantics=("parallel", "parallel", "arbitrary"),
            vmem_limit_bytes=32 * 1024 * 1024),
        cost_estimate=cost,
    )(*inputs)

    return out[:M, :Cout]


# ------------------------------- JAX glue ---------------------------------- #

def _im2col(x_nhwc, KH, KW, stride, padding):
    """Extract conv patches -> (N*Ho*Wo, KH*KW*Cin), plus output spatial dims."""
    N, H, W, Cin = x_nhwc.shape
    Ho = (H + 2 * padding - KH) // stride + 1
    Wo = (W + 2 * padding - KW) // stride + 1
    xp = jnp.pad(x_nhwc, ((0, 0), (padding, padding), (padding, padding), (0, 0)))
    cols = []
    for ky in range(KH):
        for kx in range(KW):
            cols.append(xp[:, ky:ky + stride * Ho:stride,
                           kx:kx + stride * Wo:stride, :])
    patches = jnp.concatenate(cols, axis=-1)          # (N, Ho, Wo, KH*KW*Cin)
    return patches.reshape(N * Ho * Wo, KH * KW * Cin), (N, Ho, Wo)


def _conv_bn(x_nhwc, w_hwio, scale, bias, stride, padding,
             residual_nhwc=None, relu=False, out_dtype=jnp.float32):
    KH, KW, Cin, Cout = w_hwio.shape
    # Patch extraction in bf16 halves HBM traffic of the im2col expansion.
    patches, (N, Ho, Wo) = _im2col(x_nhwc.astype(jnp.bfloat16),
                                   KH, KW, stride, padding)
    # Fold the BN scale into the weight columns: kernel epilogue is +bias only.
    w2d = (w_hwio.reshape(KH * KW * Cin, Cout)
           * scale.reshape(1, Cout)).astype(jnp.float32)
    res2d = None
    if residual_nhwc is not None:
        res2d = residual_nhwc.reshape(N * Ho * Wo, Cout)
    out2d = _fused_matmul_bias(patches, w2d, bias, residual=res2d,
                               relu=relu, out_dtype=out_dtype)
    return out2d.reshape(N, Ho, Wo, Cout)


def _fold_bn(gamma, beta, mean, var, eps=1e-5):
    scale = gamma / jnp.sqrt(var + eps)
    bias = beta - mean * scale
    return scale, bias


def residual_block_pallas(x_nchw, params, stride):
    """Forward pass of the PyTorch ResidualBlock (inference BN)."""
    x = jnp.transpose(x_nchw, (0, 2, 3, 1))           # NCHW -> NHWC
    Cin = x.shape[-1]
    Cout = params["w1"].shape[-1]

    s1, b1 = _fold_bn(*params["bn1"])
    s2, b2 = _fold_bn(*params["bn2"])

    # cnn1: conv3x3(stride) + BN + ReLU  -> keep bf16, it only feeds cnn2's MXU.
    y1 = _conv_bn(x, params["w1"], s1, b1, stride=stride, padding=1,
                  relu=True, out_dtype=jnp.bfloat16)

    # shortcut (projection conv1x1 + BN, or identity) -> f32 for the residual add.
    if stride != 1 or Cin != Cout:
        ss, bs = _fold_bn(*params["bns"])
        sc = _conv_bn(x, params["ws"], ss, bs, stride=stride, padding=0,
                      relu=False, out_dtype=jnp.float32)
    else:
        sc = x

    # cnn2: conv3x3(stride=1) + BN, then += shortcut, then ReLU (fused epilogue).
    y2 = _conv_bn(y1, params["w2"], s2, b2, stride=1, padding=1,
                  residual_nhwc=sc, relu=True, out_dtype=jnp.float32)

    return jnp.transpose(y2, (0, 3, 1, 2))            # NHWC -> NCHW


# ------------------------- plain-JAX reference ------------------------------ #

def _ref_conv(x, w, stride, padding):
    return lax.conv_general_dilated(
        x, w, (stride, stride), [(padding, padding), (padding, padding)],
        dimension_numbers=("NHWC", "HWIO", "NHWC"),
        precision=lax.Precision.HIGHEST)


def residual_block_ref(x_nchw, params, stride):
    x = jnp.transpose(x_nchw, (0, 2, 3, 1))
    Cin = x.shape[-1]
    Cout = params["w1"].shape[-1]
    s1, b1 = _fold_bn(*params["bn1"])
    s2, b2 = _fold_bn(*params["bn2"])
    y1 = jnp.maximum(_ref_conv(x, params["w1"], stride, 1) * s1 + b1, 0.0)
    y2 = _ref_conv(y1, params["w2"], 1, 1) * s2 + b2
    if stride != 1 or Cin != Cout:
        ss, bs = _fold_bn(*params["bns"])
        sc = _ref_conv(x, params["ws"], stride, 0) * ss + bs
    else:
        sc = x
    return jnp.transpose(jnp.maximum(y2 + sc, 0.0), (0, 3, 1, 2))


# ---------------------------------- main ------------------------------------ #

if __name__ == "__main__":
    in_channels, out_channels, stride = 4, 8, 2
    N, H, W = 2, 16, 16

    key = jax.random.PRNGKey(0)
    keys = jax.random.split(key, 16)

    def bn_params(k, c):
        k1, k2, k3, k4 = jax.random.split(k, 4)
        gamma = jax.random.uniform(k1, (c,), minval=0.5, maxval=1.5)
        beta = 0.1 * jax.random.normal(k2, (c,))
        mean = 0.1 * jax.random.normal(k3, (c,))
        var = jax.random.uniform(k4, (c,), minval=0.5, maxval=1.5)
        return (gamma, beta, mean, var)

    params = {
        # HWIO weights (equivalent to PyTorch OIHW weight transposed (2,3,1,0))
        "w1": 0.1 * jax.random.normal(keys[0], (3, 3, in_channels, out_channels)),
        "w2": 0.1 * jax.random.normal(keys[1], (3, 3, out_channels, out_channels)),
        "ws": 0.1 * jax.random.normal(keys[2], (1, 1, in_channels, out_channels)),
        "bn1": bn_params(keys[3], out_channels),
        "bn2": bn_params(keys[4], out_channels),
        "bns": bn_params(keys[5], out_channels),
    }

    x = jax.random.normal(keys[6], (N, in_channels, H, W), dtype=jnp.float32)

    fwd = jax.jit(functools.partial(residual_block_pallas, stride=stride))
    out = fwd(x, params)
    out = jax.block_until_ready(out)

    ref = residual_block_ref(x, params, stride)
    assert out.shape == (N, out_channels, H // stride, W // stride), out.shape
    # bf16 MXU inputs + bf16 conv1 intermediate -> compare at loosened tolerance.
    assert jnp.allclose(out, ref, rtol=2e-2, atol=2e-2), (
        float(jnp.max(jnp.abs(out - ref))))

    print("KERNEL_OK")
</pallas_src>

<mosaic_0001>
module attributes {stable_mosaic.version = 11 : i64} {
  func.func @kernel(%arg0: i32, %arg1: i32, %arg2: i32, %arg3: memref<128x128xbf16, #tpu.memory_space<vmem>>, %arg4: memref<128x128xbf16, #tpu.memory_space<vmem>>, %arg5: memref<1x128xf32, #tpu.memory_space<vmem>>, %arg6: memref<128x128xbf16, #tpu.memory_space<vmem>>, %arg7: memref<128x128xf32, #tpu.memory_space<vmem>>) attributes {dimension_semantics = [#tpu.dimension_semantics<parallel>, #tpu.dimension_semantics<parallel>, #tpu.dimension_semantics<arbitrary>], iteration_bounds = array<i64: 1, 1, 1>, scalar_prefetch = 0 : i64, scratch_operands = 1 : i64, tpu.core_type = #tpu.core_type<tc>, window_params = [{transform_indices = @transform_0, window_bounds = array<i64: 128, 128>}, {transform_indices = @transform_1, window_bounds = array<i64: 128, 128>}, {transform_indices = @transform_2, window_bounds = array<i64: 1, 128>}, {transform_indices = @transform_3, window_bounds = array<i64: 128, 128>}]} {
    %c0_i32 = arith.constant 0 : i32
    %0 = arith.cmpi eq, %arg2, %c0_i32 : i32
    %1 = arith.extui %0 : i1 to i32
    %c0_i32_0 = arith.constant 0 : i32
    %2 = arith.cmpi ne, %1, %c0_i32_0 : i32
    scf.if %2 {
      %cst_10 = arith.constant 0.000000e+00 : f32
      %12 = vector.broadcast %cst_10 : f32 to vector<128x128xf32>
      %c0_11 = arith.constant 0 : index
      %c0_12 = arith.constant 0 : index
      %13 = vector.load %arg7[%c0_11, %c0_12] : memref<128x128xf32, #tpu.memory_space<vmem>>, vector<128x128xf32>
      tpu.vector_store %arg7[%c0_11, %c0_12], %12 {strides = array<i32>} : memref<128x128xf32, #tpu.memory_space<vmem>>, vector<128x128xf32>,
    } else {
    }
    %c0 = arith.constant 0 : index
    %c0_1 = arith.constant 0 : index
    %3 = vector.load %arg7[%c0, %c0_1] : memref<128x128xf32, #tpu.memory_space<vmem>>, vector<128x128xf32>
    %c0_2 = arith.constant 0 : index
    %c0_3 = arith.constant 0 : index
    %4 = vector.load %arg3[%c0_2, %c0_3] : memref<128x128xbf16, #tpu.memory_space<vmem>>, vector<128x128xbf16>
    %c0_4 = arith.constant 0 : index
    %c0_5 = arith.constant 0 : index
    %5 = vector.load %arg4[%c0_4, %c0_5] : memref<128x128xbf16, #tpu.memory_space<vmem>>, vector<128x128xbf16>
    %cst = arith.constant dense<0.000000e+00> : vector<128x128xf32>
    %6 = tpu.matmul %4, %5, %cst {dimension_numbers = #tpu.dot_dimension_numbers<[1], [0], [0], [1], [0, 0, 1, 1], [], []>} : vector<128x128xbf16>, vector<128x128xbf16>, vector<128x128xf32> -> vector<128x128xf32>
    %7 = arith.addf %3, %6 : vector<128x128xf32>
    %c0_6 = arith.constant 0 : index
    %c0_7 = arith.constant 0 : index
    %8 = vector.load %arg7[%c0_6, %c0_7] : memref<128x128xf32, #tpu.memory_space<vmem>>, vector<128x128xf32>
    tpu.vector_store %arg7[%c0_6, %c0_7], %7 {strides = array<i32>} : memref<128x128xf32, #tpu.memory_space<vmem>>, vector<128x128xf32>,
    %c0_i32_8 = arith.constant 0 : i32
    %9 = arith.cmpi eq, %arg2, %c0_i32_8 : i32
    %10 = arith.extui %9 : i1 to i32
    %c0_i32_9 = arith.constant 0 : i32
    %11 = arith.cmpi ne, %10, %c0_i32_9 : i32
    scf.if %11 {
      %c0_10 = arith.constant 0 : index
      %c0_11 = arith.constant 0 : index
      %12 = vector.load %arg7[%c0_10, %c0_11] : memref<128x128xf32, #tpu.memory_space<vmem>>, vector<128x128xf32>
      %c0_12 = arith.constant 0 : index
      %c0_13 = arith.constant 0 : index
      %13 = vector.load %arg5[%c0_12, %c0_13] : memref<1x128xf32, #tpu.memory_space<vmem>>, vector<1x128xf32>
      %14 = vector.broadcast %13 : vector<1x128xf32> to vector<128x128xf32>
      %15 = arith.addf %12, %14 : vector<128x128xf32>
      %cst_14 = arith.constant 0.000000e+00 : f32
      %16 = vector.broadcast %cst_14 : f32 to vector<128x128xf32>
      %17 = arith.maximumf %15, %16 : vector<128x128xf32>
      %18 = arith.truncf %17 : vector<128x128xf32> to vector<128x128xbf16>
      %c0_15 = arith.constant 0 : index
      %c0_16 = arith.constant 0 : index
      %19 = vector.load %arg6[%c0_15, %c0_16] : memref<128x128xbf16, #tpu.memory_space<vmem>>, vector<128x128xbf16>
      tpu.vector_store %arg6[%c0_15, %c0_16], %18 {strides = array<i32>} : memref<128x128xbf16, #tpu.memory_space<vmem>>, vector<128x128xbf16>,
    } else {
    }
    return
  }
  func.func @transform_0(%arg0: i32, %arg1: i32, %arg2: i32) -> (i32, i32) {
    %c0_i32 = arith.constant 0 : i32
    return %arg0, %arg2 : i32, i32
  }
  func.func @transform_1(%arg0: i32, %arg1: i32, %arg2: i32) -> (i32, i32) {
    %c0_i32 = arith.constant 0 : i32
    return %arg2, %arg1 : i32, i32
  }
  func.func @transform_2(%arg0: i32, %arg1: i32, %arg2: i32) -> (i32, i32) {
    %c0_i32 = arith.constant 0 : i32
    %c0_i32_0 = arith.constant 0 : i32
    return %c0_i32, %arg1 : i32, i32
  }
  func.func @transform_3(%arg0: i32, %arg1: i32, %arg2: i32) -> (i32, i32) {
    %c0_i32 = arith.constant 0 : i32
    return %arg0, %arg1 : i32, i32
  }
}

module attributes {stable_mosaic.version = 11 : i64} {
  func.func @kernel(%arg0: i32, %arg1: i32, %arg2: i32, %arg3: memref<128x128xbf16, #tpu.memory_space<vmem>>, %arg4: memref<128x128xbf16, #tpu.memory_space<vmem>>, %arg5: memref<1x128xf32, #tpu.memory_space<vmem>>, %arg6: memref<128x128xf32, #tpu.memory_space<vmem>>, %arg7: memref<128x128xf32, #tpu.memory_space<vmem>>) attributes {dimension_semantics = [#tpu.dimension_semantics<parallel>, #tpu.dimension_semantics<parallel>, #tpu.dimension_semantics<arbitrary>], iteration_bounds = array<i64: 1, 1, 1>, scalar_prefetch = 0 : i64, scratch_operands = 1 : i64, tpu.core_type = #tpu.core_type<tc>, window_params = [{transform_indices = @transform_0, window_bounds = array<i64: 128, 128>}, {transform_indices = @transform_1, window_bounds = array<i64: 128, 128>}, {transform_indices = @transform_2, window_bounds = array<i64: 1, 128>}, {transform_indices = @transform_3, window_bounds = array<i64: 128, 128>}]} {
    %c0_i32 = arith.constant 0 : i32
    %0 = arith.cmpi eq, %arg2, %c0_i32 : i32
    %1 = arith.extui %0 : i1 to i32
    %c0_i32_0 = arith.constant 0 : i32
    %2 = arith.cmpi ne, %1, %c0_i32_0 : i32
    scf.if %2 {
      %cst_10 = arith.constant 0.000000e+00 : f32
      %12 = vector.broadcast %cst_10 : f32 to vector<128x128xf32>
      %c0_11 = arith.constant 0 : index
      %c0_12 = arith.constant 0 : index
      %13 = vector.load %arg7[%c0_11, %c0_12] : memref<128x128xf32, #tpu.memory_space<vmem>>, vector<128x128xf32>
      tpu.vector_store %arg7[%c0_11, %c0_12], %12 {strides = array<i32>} : memref<128x128xf32, #tpu.memory_space<vmem>>, vector<128x128xf32>,
    } else {
    }
    %c0 = arith.constant 0 : index
    %c0_1 = arith.constant 0 : index
    %3 = vector.load %arg7[%c0, %c0_1] : memref<128x128xf32, #tpu.memory_space<vmem>>, vector<128x128xf32>
    %c0_2 = arith.constant 0 : index
    %c0_3 = arith.constant 0 : index
    %4 = vector.load %arg3[%c0_2, %c0_3] : memref<128x128xbf16, #tpu.memory_space<vmem>>, vector<128x128xbf16>
    %c0_4 = arith.constant 0 : index
    %c0_5 = arith.constant 0 : index
    %5 = vector.load %arg4[%c0_4, %c0_5] : memref<128x128xbf16, #tpu.memory_space<vmem>>, vector<128x128xbf16>
    %cst = arith.constant dense<0.000000e+00> : vector<128x128xf32>
    %6 = tpu.matmul %4, %5, %cst {dimension_numbers = #tpu.dot_dimension_numbers<[1], [0], [0], [1], [0, 0, 1, 1], [], []>} : vector<128x128xbf16>, vector<128x128xbf16>, vector<128x128xf32> -> vector<128x128xf32>
    %7 = arith.addf %3, %6 : vector<128x128xf32>
    %c0_6 = arith.constant 0 : index
    %c0_7 = arith.constant 0 : index
    %8 = vector.load %arg7[%c0_6, %c0_7] : memref<128x128xf32, #tpu.memory_space<vmem>>, vector<128x128xf32>
    tpu.vector_store %arg7[%c0_6, %c0_7], %7 {strides = array<i32>} : memref<128x128xf32, #tpu.memory_space<vmem>>, vector<128x128xf32>,
    %c0_i32_8 = arith.constant 0 : i32
    %9 = arith.cmpi eq, %arg2, %c0_i32_8 : i32
    %10 = arith.extui %9 : i1 to i32
    %c0_i32_9 = arith.constant 0 : i32
    %11 = arith.cmpi ne, %10, %c0_i32_9 : i32
    scf.if %11 {
      %c0_10 = arith.constant 0 : index
      %c0_11 = arith.constant 0 : index
      %12 = vector.load %arg7[%c0_10, %c0_11] : memref<128x128xf32, #tpu.memory_space<vmem>>, vector<128x128xf32>
      %c0_12 = arith.constant 0 : index
      %c0_13 = arith.constant 0 : index
      %13 = vector.load %arg5[%c0_12, %c0_13] : memref<1x128xf32, #tpu.memory_space<vmem>>, vector<1x128xf32>
      %14 = vector.broadcast %13 : vector<1x128xf32> to vector<128x128xf32>
      %15 = arith.addf %12, %14 : vector<128x128xf32>
      %c0_14 = arith.constant 0 : index
      %c0_15 = arith.constant 0 : index
      %16 = vector.load %arg6[%c0_14, %c0_15] : memref<128x128xf32, #tpu.memory_space<vmem>>, vector<128x128xf32>
      tpu.vector_store %arg6[%c0_14, %c0_15], %15 {strides = array<i32>} : memref<128x128xf32, #tpu.memory_space<vmem>>, vector<128x128xf32>,
    } else {
    }
    return
  }
  func.func @transform_0(%arg0: i32, %arg1: i32, %arg2: i32) -> (i32, i32) {
    %c0_i32 = arith.constant 0 : i32
    return %arg0, %arg2 : i32, i32
  }
  func.func @transform_1(%arg0: i32, %arg1: i32, %arg2: i32) -> (i32, i32) {
    %c0_i32 = arith.constant 0 : i32
    return %arg2, %arg1 : i32, i32
  }
  func.func @transform_2(%arg0: i32, %arg1: i32, %arg2: i32) -> (i32, i32) {
    %c0_i32 = arith.constant 0 : i32
    %c0_i32_0 = arith.constant 0 : i32
    return %c0_i32, %arg1 : i32, i32
  }
  func.func @transform_3(%arg0: i32, %arg1: i32, %arg2: i32) -> (i32, i32) {
    %c0_i32 = arith.constant 0 : i32
    return %arg0, %arg1 : i32, i32
  }
}

module attributes {stable_mosaic.version = 11 : i64} {
  func.func @kernel(%arg0: i32, %arg1: i32, %arg2: i32, %arg3: memref<128x128xbf16, #tpu.memory_space<vmem>>, %arg4: memref<128x128xbf16, #tpu.memory_space<vmem>>, %arg5: memref<1x128xf32, #tpu.memory_space<vmem>>, %arg6: memref<128x128xf32, #tpu.memory_space<vmem>>, %arg7: memref<128x128xf32, #tpu.memory_space<vmem>>, %arg8: memref<128x128xf32, #tpu.memory_space<vmem>>) attributes {dimension_semantics = [#tpu.dimension_semantics<parallel>, #tpu.dimension_semantics<parallel>, #tpu.dimension_semantics<arbitrary>], iteration_bounds = array<i64: 1, 1, 1>, scalar_prefetch = 0 : i64, scratch_operands = 1 : i64, tpu.core_type = #tpu.core_type<tc>, window_params = [{transform_indices = @transform_0, window_bounds = array<i64: 128, 128>}, {transform_indices = @transform_1, window_bounds = array<i64: 128, 128>}, {transform_indices = @transform_2, window_bounds = array<i64: 1, 128>}, {transform_indices = @transform_3, window_bounds = array<i64: 128, 128>}, {transform_indices = @transform_4, window_bounds = array<i64: 128, 128>}]} {
    %c0_i32 = arith.constant 0 : i32
    %0 = arith.cmpi eq, %arg2, %c0_i32 : i32
    %1 = arith.extui %0 : i1 to i32
    %c0_i32_0 = arith.constant 0 : i32
    %2 = arith.cmpi ne, %1, %c0_i32_0 : i32
    scf.if %2 {
      %cst_10 = arith.constant 0.000000e+00 : f32
      %12 = vector.broadcast %cst_10 : f32 to vector<128x128xf32>
      %c0_11 = arith.constant 0 : index
      %c0_12 = arith.constant 0 : index
      %13 = vector.load %arg8[%c0_11, %c0_12] : memref<128x128xf32, #tpu.memory_space<vmem>>, vector<128x128xf32>
      tpu.vector_store %arg8[%c0_11, %c0_12], %12 {strides = array<i32>} : memref<128x128xf32, #tpu.memory_space<vmem>>, vector<128x128xf32>,
    } else {
    }
    %c0 = arith.constant 0 : index
    %c0_1 = arith.constant 0 : index
    %3 = vector.load %arg8[%c0, %c0_1] : memref<128x128xf32, #tpu.memory_space<vmem>>, vector<128x128xf32>
    %c0_2 = arith.constant 0 : index
    %c0_3 = arith.constant 0 : index
    %4 = vector.load %arg3[%c0_2, %c0_3] : memref<128x128xbf16, #tpu.memory_space<vmem>>, vector<128x128xbf16>
    %c0_4 = arith.constant 0 : index
    %c0_5 = arith.constant 0 : index
    %5 = vector.load %arg4[%c0_4, %c0_5] : memref<128x128xbf16, #tpu.memory_space<vmem>>, vector<128x128xbf16>
    %cst = arith.constant dense<0.000000e+00> : vector<128x128xf32>
    %6 = tpu.matmul %4, %5, %cst {dimension_numbers = #tpu.dot_dimension_numbers<[1], [0], [0], [1], [0, 0, 1, 1], [], []>} : vector<128x128xbf16>, vector<128x128xbf16>, vector<128x128xf32> -> vector<128x128xf32>
    %7 = arith.addf %3, %6 : vector<128x128xf32>
    %c0_6 = arith.constant 0 : index
    %c0_7 = arith.constant 0 : index
    %8 = vector.load %arg8[%c0_6, %c0_7] : memref<128x128xf32, #tpu.memory_space<vmem>>, vector<128x128xf32>
    tpu.vector_store %arg8[%c0_6, %c0_7], %7 {strides = array<i32>} : memref<128x128xf32, #tpu.memory_space<vmem>>, vector<128x128xf32>,
    %c0_i32_8 = arith.constant 0 : i32
    %9 = arith.cmpi eq, %arg2, %c0_i32_8 : i32
    %10 = arith.extui %9 : i1 to i32
    %c0_i32_9 = arith.constant 0 : i32
    %11 = arith.cmpi ne, %10, %c0_i32_9 : i32
    scf.if %11 {
      %c0_10 = arith.constant 0 : index
      %c0_11 = arith.constant 0 : index
      %12 = vector.load %arg8[%c0_10, %c0_11] : memref<128x128xf32, #tpu.memory_space<vmem>>, vector<128x128xf32>
      %c0_12 = arith.constant 0 : index
      %c0_13 = arith.constant 0 : index
      %13 = vector.load %arg5[%c0_12, %c0_13] : memref<1x128xf32, #tpu.memory_space<vmem>>, vector<1x128xf32>
      %14 = vector.broadcast %13 : vector<1x128xf32> to vector<128x128xf32>
      %15 = arith.addf %12, %14 : vector<128x128xf32>
      %c0_14 = arith.constant 0 : index
      %c0_15 = arith.constant 0 : index
      %16 = vector.load %arg6[%c0_14, %c0_15] : memref<128x128xf32, #tpu.memory_space<vmem>>, vector<128x128xf32>
      %17 = arith.addf %15, %16 : vector<128x128xf32>
      %cst_16 = arith.constant 0.000000e+00 : f32
      %18 = vector.broadcast %cst_16 : f32 to vector<128x128xf32>
      %19 = arith.maximumf %17, %18 : vector<128x128xf32>
      %c0_17 = arith.constant 0 : index
      %c0_18 = arith.constant 0 : index
      %20 = vector.load %arg7[%c0_17, %c0_18] : memref<128x128xf32, #tpu.memory_space<vmem>>, vector<128x128xf32>
      tpu.vector_store %arg7[%c0_17, %c0_18], %19 {strides = array<i32>} : memref<128x128xf32, #tpu.memory_space<vmem>>, vector<128x128xf32>,
    } else {
    }
    return
  }
  func.func @transform_0(%arg0: i32, %arg1: i32, %arg2: i32) -> (i32, i32) {
    %c0_i32 = arith.constant 0 : i32
    return %arg0, %arg2 : i32, i32
  }
  func.func @transform_1(%arg0: i32, %arg1: i32, %arg2: i32) -> (i32, i32) {
    %c0_i32 = arith.constant 0 : i32
    return %arg2, %arg1 : i32, i32
  }
  func.func @transform_2(%arg0: i32, %arg1: i32, %arg2: i32) -> (i32, i32) {
    %c0_i32 = arith.constant 0 : i32
    %c0_i32_0 = arith.constant 0 : i32
    return %c0_i32, %arg1 : i32, i32
  }
  func.func @transform_3(%arg0: i32, %arg1: i32, %arg2: i32) -> (i32, i32) {
    %c0_i32 = arith.constant 0 : i32
    return %arg0, %arg1 : i32, i32
  }
  func.func @transform_4(%arg0: i32, %arg1: i32, %arg2: i32) -> (i32, i32) {
    %c0_i32 = arith.constant 0 : i32
    return %arg0, %arg1 : i32, i32
  }
}

</mosaic_0001>

<bundles_post_ra>
// kernel: residual_block_pallas.3
= control target key start
LH: loop header
LB: loop body
LE: loop exit
PB: predicated region body
PF: predicated region fallthrough
CT: control target
= control target key end

     0   :  { %s721_s1 = inlined_call_operand.vmem [shape: bf16[128,128], index: 1, kind: input, shape index: {}]   ;;  %s722_s0 = inlined_call_operand.vmem [shape: bf16[128,128], index: 0, kind: input, shape index: {}]   ;;  %s723_s2 = inlined_call_operand.vmem [shape: f32[1,128], index: 2, kind: input, shape index: {}]   ;;  %s724_s3 = inlined_call_operand.vmem [shape: bf16[128,128], index: 3, kind: output, shape index: {}]  }
   0x1   :  { %v610_v0 = vld [vmem:[%s721_s1] sm:$0xff]   ;;  %v611_v1 = vld [vmem:[%s721_s1 + $0x8] sm:$0xff]   ;;  %v612_v2 = vld [vmem:[%s721_s1 + $0x10] sm:$0xff]  }
   0x2   :  { %562 = vmatprep.subr.bf16.mxu0 %v610_v0  ;;  %594 = vmatprep.subr.bf16.mxu1 %v610_v0  ;;  %v613_v3 = vld [vmem:[%s721_s1 + $0x18] sm:$0xff]   ;;  %v618_v4 = vld [vmem:[%s722_s0] sm:$0xff]   ;;  %v615_v7 = vld [vmem:[%s721_s1 + $0x28] sm:$0xff]  }
   0x3   :  { %563 = vmatpush3.bf16.msra.mxu0 %v610_v0  ;;  %602 = vmatpush3.bf16.msra.mxu1 %v610_v0  ;;  %v619_v5 = vld [vmem:[%s722_s0 + $0x20] sm:$0xff]   ;;  %v616_v8 = vld [vmem:[%s721_s1 + $0x30] sm:$0xff]   ;;  %v617_v9 = vld [vmem:[%s721_s1 + $0x38] sm:$0xff]  }
   0x4   :  { %564 = vmatprep.subr.bf16.mxu0 %v611_v1  ;;  %595 = vmatprep.subr.bf16.mxu1 %v611_v1  ;;  %v614_v6 = vld [vmem:[%s721_s1 + $0x20] sm:$0xff]   ;;  %v620_v10 = vld [vmem:[%s722_s0 + $0x8] sm:$0xff]   ;;  %v622_v12 = vld [vmem:[%s722_s0 + $0x10] sm:$0xff]  }
   0x5   :  { %578 = vmatprep.mubr.bf16.mxu0 %v618_v4  ;;  %586 = vmatprep.mubr.bf16.mxu1 %v619_v5  ;;  %v621_v11 = vld [vmem:[%s722_s0 + $0x28] sm:$0xff]   ;;  %v623_v13 = vld [vmem:[%s722_s0 + $0x30] sm:$0xff]   ;;  %v624_v14 = vld [vmem:[%s722_s0 + $0x18] sm:$0xff]  }
   0x6   :  { %v625_v15 = vld [vmem:[%s722_s0 + $0x38] sm:$0xff]   ;;  %v466_v16 = vld [vmem:[%s723_s2] ss:$0 sm:$0xff] }
   0x7   :  { %565 = vmatpush3.bf16.msra.mxu0 %v611_v1  ;;  %603 = vmatpush3.bf16.msra.mxu1 %v611_v1 }
   0x8   :  { %566 = vmatprep.subr.bf16.mxu0 %v612_v2  ;;  %596 = vmatprep.subr.bf16.mxu1 %v612_v2 }
   0xb   :  { %567 = vmatpush3.bf16.msra.mxu0 %v612_v2  ;;  %604 = vmatpush3.bf16.msra.mxu1 %v612_v2 }
   0xc   :  { %568 = vmatprep.subr.bf16.mxu0 %v613_v3  ;;  %597 = vmatprep.subr.bf16.mxu1 %v613_v3 }
   0xf   :  { %569 = vmatpush3.bf16.msra.mxu0 %v613_v3  ;;  %605 = vmatpush3.bf16.msra.mxu1 %v613_v3 }
  0x10   :  { %570 = vmatprep.subr.bf16.mxu0 %v614_v6  ;;  %598 = vmatprep.subr.bf16.mxu1 %v614_v6 }
  0x13   :  { %571 = vmatpush3.bf16.msra.mxu0 %v614_v6  ;;  %606 = vmatpush3.bf16.msra.mxu1 %v614_v6 }
  0x14   :  { %572 = vmatprep.subr.bf16.mxu0 %v615_v7  ;;  %599 = vmatprep.subr.bf16.mxu1 %v615_v7 }
  0x17   :  { %573 = vmatpush3.bf16.msra.mxu0 %v615_v7  ;;  %607 = vmatpush3.bf16.msra.mxu1 %v615_v7 }
  0x18   :  { %574 = vmatprep.subr.bf16.mxu0 %v616_v8  ;;  %600 = vmatprep.subr.bf16.mxu1 %v616_v8 }
  0x1b   :  { %575 = vmatpush3.bf16.msra.mxu0 %v616_v8  ;;  %608 = vmatpush3.bf16.msra.mxu1 %v616_v8 }
  0x1c   :  { %576 = vmatprep.subr.bf16.mxu0 %v617_v9  ;;  %601 = vmatprep.subr.bf16.mxu1 %v617_v9 }
  0x1f   :  { %577 = vmatpush3.bf16.msra.mxu0 %v617_v9  ;;  %609 = vmatpush3.bf16.msra.mxu1 %v617_v9 }
  0x22   :  { %579 = vmatmul.mubr.bf16.vlgmr.msra.gmra.mrb[0].mxu0 %v620_v10  ;;  %587 = vmatmul.mubr.bf16.vlgmr.msra.gmra.mrb[0].mxu1 %v621_v11 }
  0x23   :  { %582 = vmatprep.mubr.bf16.mxu0 %v622_v12  ;;  %590 = vmatprep.mubr.bf16.mxu1 %v623_v13 }
  0x2a   :  { %583 = vmatmul.mubr.bf16.gmra.mrb[4].mxu0 %v624_v14  ;;  %591 = vmatmul.mubr.bf16.gmra.mrb[4].mxu1 %v625_v15 }
  0xf5   :  { %v580_v17 = vpop.f32.mrb[0].mxu0  ;;  %v588_v18 = vpop.f32.mrb[0].mxu1 }
  0xf6   :  { %v336_v19 = vadd.f32 %v580_v17, %v466_v16  ;;  %v344_v20 = vadd.f32 %v588_v18, %v466_v16  ;;  %v213_v21 = vpop.f32.mrb[1].mxu0  ;;  %v245_v22 = vpop.f32.mrb[1].mxu1 }
  0xf7   :  { %v334_v23 = vadd.f32 %v466_v16, %v213_v21  ;;  %v342_v24 = vadd.f32 %v466_v16, %v245_v22  ;;  %v581_v25 = vpop.f32.mrb[2].mxu0  ;;  %v589_v26 = vpop.f32.mrb[2].mxu1 }
  0xf8   :  { %v337_v27 = vadd.f32 %v581_v25, %v466_v16  ;;  %v345_v28 = vadd.f32 %v589_v26, %v466_v16  ;;  %v216_v29 = vpop.f32.mrb[3].mxu0  ;;  %v248_v30 = vpop.f32.mrb[3].mxu1  ;;  %v352_v33 = vmax.f32 %v336_v19, 0.0  ;;  %v360_v34 = vmax.f32 %v344_v20, 0.0 }
  0xf9   :  { %v335_v31 = vadd.f32 %v466_v16, %v216_v29  ;;  %v343_v32 = vadd.f32 %v466_v16, %v248_v30  ;;  %v350_v37 = vmax.f32 %v334_v23, 0.0  ;;  %v358_v38 = vmax.f32 %v342_v24, 0.0 }
  0xfa   :  { %v353_v35 = vmax.f32 %v337_v27, 0.0  ;;  %v361_v36 = vmax.f32 %v345_v28, 0.0 }
  0xfb   :  { %v351_v39 = vmax.f32 %v335_v31, 0.0  ;;  %v359_v40 = vmax.f32 %v343_v32, 0.0 }
  0xfc   :  { %v507_v41 = vpack.c.bf16 %v353_v35, %v352_v33  ;;  %v527_v42 = vpack.c.bf16 %v361_v36, %v360_v34 }
  0xfd   :  { %v502_v43 = vpack.c.bf16 %v351_v39, %v350_v37  ;;  %v522_v44 = vpack.c.bf16 %v359_v40, %v358_v38  ;;  %v584_v45 = vpop.f32.mrb[4].mxu0  ;;  %v592_v46 = vpop.f32.mrb[4].mxu1 }
  0xfe   :  { %539 = vst [vmem:[%s724_s3 + $0x8] sm:$0xff] %v507_v41   ;;  %543 = vst [vmem:[%s724_s3 + $0x28] sm:$0xff] %v527_v42   ;;  %v340_v47 = vadd.f32 %v584_v45, %v466_v16  ;;  %v348_v48 = vadd.f32 %v592_v46, %v466_v16  ;;  %v229_v49 = vpop.f32.mrb[5].mxu0  ;;  %v261_v50 = vpop.f32.mrb[5].mxu1 }
  0xff   :  { %503 = vst [vmem:[%s724_s3] sm:$0xff] %v502_v43   ;;  %542 = vst [vmem:[%s724_s3 + $0x20] sm:$0xff] %v522_v44   ;;  %v338_v51 = vadd.f32 %v466_v16, %v229_v49  ;;  %v346_v52 = vadd.f32 %v466_v16, %v261_v50  ;;  %v585_v53 = vpop.f32.mrb[6].mxu0  ;;  %v593_v54 = vpop.f32.mrb[6].mxu1 }
 0x100   :  { %v341_v55 = vadd.f32 %v585_v53, %v466_v16  ;;  %v349_v56 = vadd.f32 %v593_v54, %v466_v16  ;;  %v232_v57 = vpop.f32.mrb[7].mxu0  ;;  %v264_v58 = vpop.f32.mrb[7].mxu1  ;;  %v356_v61 = vmax.f32 %v340_v47, 0.0  ;;  %v364_v62 = vmax.f32 %v348_v48, 0.0 }
 0x101   :  { %v339_v59 = vadd.f32 %v466_v16, %v232_v57  ;;  %v347_v60 = vadd.f32 %v466_v16, %v264_v58  ;;  %v354_v1 = vmax.f32 %v338_v51, 0.0  ;;  %v362_v2 = vmax.f32 %v346_v52, 0.0 }
 0x102   :  { %v357_v63 = vmax.f32 %v341_v55, 0.0  ;;  %v365_v0 = vmax.f32 %v349_v56, 0.0 }
 0x103   :  { %v355_v3 = vmax.f32 %v339_v59, 0.0  ;;  %v363_v4 = vmax.f32 %v347_v60, 0.0 }
 0x104   :  { %v517_v5 = vpack.c.bf16 %v357_v63, %v356_v61  ;;  %v537_v6 = vpack.c.bf16 %v365_v0, %v364_v62 }
 0x105   :  { %v512_v7 = vpack.c.bf16 %v355_v3, %v354_v1  ;;  %v532_v8 = vpack.c.bf16 %v363_v4, %v362_v2 }
 0x106   :  { %541 = vst [vmem:[%s724_s3 + $0x18] sm:$0xff] %v517_v5   ;;  %545 = vst [vmem:[%s724_s3 + $0x38] sm:$0xff] %v537_v6  }
 0x107   :  { %540 = vst [vmem:[%s724_s3 + $0x10] sm:$0xff] %v512_v7   ;;  %544 = vst [vmem:[%s724_s3 + $0x30] sm:$0xff] %v532_v8  }

// kernel: residual_block_pallas.4
= control target key start
LH: loop header
LB: loop body
LE: loop exit
PB: predicated region body
PF: predicated region fallthrough
CT: control target
= control target key end

     0   :  { %s586_s1 = inlined_call_operand.vmem [shape: bf16[128,128], index: 1, kind: input, shape index: {}]   ;;  %s587_s0 = inlined_call_operand.vmem [shape: bf16[128,128], index: 0, kind: input, shape index: {}]   ;;  %s588_s2 = inlined_call_operand.vmem [shape: f32[1,128], index: 2, kind: input, shape index: {}]   ;;  %s589_s3 = inlined_call_operand.vmem [shape: f32[128,128], index: 3, kind: output, shape index: {}]  }
   0x1   :  { %v451_v0 = vld [vmem:[%s586_s1] sm:$0xff]   ;;  %v452_v1 = vld [vmem:[%s586_s1 + $0x8] sm:$0xff]   ;;  %v453_v2 = vld [vmem:[%s586_s1 + $0x10] sm:$0xff]  }
   0x2   :  { %403 = vmatprep.subr.bf16.mxu0 %v451_v0  ;;  %435 = vmatprep.subr.bf16.mxu1 %v451_v0  ;;  %v454_v3 = vld [vmem:[%s586_s1 + $0x18] sm:$0xff]   ;;  %v459_v4 = vld [vmem:[%s587_s0] sm:$0xff]   ;;  %v456_v7 = vld [vmem:[%s586_s1 + $0x28] sm:$0xff]  }
   0x3   :  { %404 = vmatpush3.bf16.msra.mxu0 %v451_v0  ;;  %443 = vmatpush3.bf16.msra.mxu1 %v451_v0  ;;  %v460_v5 = vld [vmem:[%s587_s0 + $0x20] sm:$0xff]   ;;  %v457_v8 = vld [vmem:[%s586_s1 + $0x30] sm:$0xff]   ;;  %v458_v9 = vld [vmem:[%s586_s1 + $0x38] sm:$0xff]  }
   0x4   :  { %405 = vmatprep.subr.bf16.mxu0 %v452_v1  ;;  %436 = vmatprep.subr.bf16.mxu1 %v452_v1  ;;  %v455_v6 = vld [vmem:[%s586_s1 + $0x20] sm:$0xff]   ;;  %v461_v10 = vld [vmem:[%s587_s0 + $0x8] sm:$0xff]   ;;  %v463_v12 = vld [vmem:[%s587_s0 + $0x10] sm:$0xff]  }
   0x5   :  { %419 = vmatprep.mubr.bf16.mxu0 %v459_v4  ;;  %427 = vmatprep.mubr.bf16.mxu1 %v460_v5  ;;  %v462_v11 = vld [vmem:[%s587_s0 + $0x28] sm:$0xff]   ;;  %v464_v13 = vld [vmem:[%s587_s0 + $0x30] sm:$0xff]   ;;  %v465_v14 = vld [vmem:[%s587_s0 + $0x18] sm:$0xff]  }
   0x6   :  { %v466_v15 = vld [vmem:[%s587_s0 + $0x38] sm:$0xff]   ;;  %v386_v16 = vld [vmem:[%s588_s2] ss:$0 sm:$0xff] }
   0x7   :  { %406 = vmatpush3.bf16.msra.mxu0 %v452_v1  ;;  %444 = vmatpush3.bf16.msra.mxu1 %v452_v1 }
   0x8   :  { %407 = vmatprep.subr.bf16.mxu0 %v453_v2  ;;  %437 = vmatprep.subr.bf16.mxu1 %v453_v2 }
   0xb   :  { %408 = vmatpush3.bf16.msra.mxu0 %v453_v2  ;;  %445 = vmatpush3.bf16.msra.mxu1 %v453_v2 }
   0xc   :  { %409 = vmatprep.subr.bf16.mxu0 %v454_v3  ;;  %438 = vmatprep.subr.bf16.mxu1 %v454_v3 }
   0xf   :  { %410 = vmatpush3.bf16.msra.mxu0 %v454_v3  ;;  %446 = vmatpush3.bf16.msra.mxu1 %v454_v3 }
  0x10   :  { %411 = vmatprep.subr.bf16.mxu0 %v455_v6  ;;  %439 = vmatprep.subr.bf16.mxu1 %v455_v6 }
  0x13   :  { %412 = vmatpush3.bf16.msra.mxu0 %v455_v6  ;;  %447 = vmatpush3.bf16.msra.mxu1 %v455_v6 }
  0x14   :  { %413 = vmatprep.subr.bf16.mxu0 %v456_v7  ;;  %440 = vmatprep.subr.bf16.mxu1 %v456_v7 }
  0x17   :  { %414 = vmatpush3.bf16.msra.mxu0 %v456_v7  ;;  %448 = vmatpush3.bf16.msra.mxu1 %v456_v7 }
  0x18   :  { %415 = vmatprep.subr.bf16.mxu0 %v457_v8  ;;  %441 = vmatprep.subr.bf16.mxu1 %v457_v8 }
  0x1b   :  { %416 = vmatpush3.bf16.msra.mxu0 %v457_v8  ;;  %449 = vmatpush3.bf16.msra.mxu1 %v457_v8 }
  0x1c   :  { %417 = vmatprep.subr.bf16.mxu0 %v458_v9  ;;  %442 = vmatprep.subr.bf16.mxu1 %v458_v9 }
  0x1f   :  { %418 = vmatpush3.bf16.msra.mxu0 %v458_v9  ;;  %450 = vmatpush3.bf16.msra.mxu1 %v458_v9 }
  0x22   :  { %420 = vmatmul.mubr.bf16.vlgmr.msra.gmra.mrb[0].mxu0 %v461_v10  ;;  %428 = vmatmul.mubr.bf16.vlgmr.msra.gmra.mrb[0].mxu1 %v462_v11 }
  0x23   :  { %423 = vmatprep.mubr.bf16.mxu0 %v463_v12  ;;  %431 = vmatprep.mubr.bf16.mxu1 %v464_v13 }
  0x2a   :  { %424 = vmatmul.mubr.bf16.gmra.mrb[4].mxu0 %v465_v14  ;;  %432 = vmatmul.mubr.bf16.gmra.mrb[4].mxu1 %v466_v15 }
  0xf5   :  { %v421_v17 = vpop.f32.mrb[0].mxu0  ;;  %v429_v18 = vpop.f32.mrb[0].mxu1 }
  0xf6   :  { %v336_v19 = vadd.f32 %v421_v17, %v386_v16  ;;  %v344_v20 = vadd.f32 %v429_v18, %v386_v16  ;;  %v213_v21 = vpop.f32.mrb[1].mxu0  ;;  %v245_v22 = vpop.f32.mrb[1].mxu1 }
  0xf7   :  { %v334_v23 = vadd.f32 %v386_v16, %v213_v21  ;;  %v342_v24 = vadd.f32 %v386_v16, %v245_v22  ;;  %v422_v25 = vpop.f32.mrb[2].mxu0  ;;  %v430_v26 = vpop.f32.mrb[2].mxu1 }
  0xf8   :  { %352 = vst [vmem:[%s589_s3 + $0x10] sm:$0xff] %v336_v19  ;;  %360 = vst [vmem:[%s589_s3 + $0x50] sm:$0xff] %v344_v20  ;;  %v337_v27 = vadd.f32 %v422_v25, %v386_v16  ;;  %v345_v28 = vadd.f32 %v430_v26, %v386_v16  ;;  %v216_v29 = vpop.f32.mrb[3].mxu0  ;;  %v248_v30 = vpop.f32.mrb[3].mxu1 }
  0xf9   :  { %350 = vst [vmem:[%s589_s3] sm:$0xff] %v334_v23  ;;  %358 = vst [vmem:[%s589_s3 + $0x40] sm:$0xff] %v342_v24  ;;  %v335_v31 = vadd.f32 %v386_v16, %v216_v29  ;;  %v343_v32 = vadd.f32 %v386_v16, %v248_v30 }
  0xfa   :  { %353 = vst [vmem:[%s589_s3 + $0x18] sm:$0xff] %v337_v27  ;;  %361 = vst [vmem:[%s589_s3 + $0x58] sm:$0xff] %v345_v28 }
  0xfb   :  { %351 = vst [vmem:[%s589_s3 + $0x8] sm:$0xff] %v335_v31  ;;  %359 = vst [vmem:[%s589_s3 + $0x48] sm:$0xff] %v343_v32 }
  0xfd   :  { %v425_v33 = vpop.f32.mrb[4].mxu0  ;;  %v433_v34 = vpop.f32.mrb[4].mxu1 }
  0xfe   :  { %v340_v35 = vadd.f32 %v425_v33, %v386_v16  ;;  %v348_v36 = vadd.f32 %v433_v34, %v386_v16  ;;  %v229_v37 = vpop.f32.mrb[5].mxu0  ;;  %v261_v38 = vpop.f32.mrb[5].mxu1 }
  0xff   :  { %v338_v39 = vadd.f32 %v386_v16, %v229_v37  ;;  %v346_v40 = vadd.f32 %v386_v16, %v261_v38  ;;  %v426_v41 = vpop.f32.mrb[6].mxu0  ;;  %v434_v42 = vpop.f32.mrb[6].mxu1 }
 0x100   :  { %356 = vst [vmem:[%s589_s3 + $0x30] sm:$0xff] %v340_v35  ;;  %364 = vst [vmem:[%s589_s3 + $0x70] sm:$0xff] %v348_v36  ;;  %v341_v43 = vadd.f32 %v426_v41, %v386_v16  ;;  %v349_v44 = vadd.f32 %v434_v42, %v386_v16  ;;  %v232_v45 = vpop.f32.mrb[7].mxu0  ;;  %v264_v46 = vpop.f32.mrb[7].mxu1 }
 0x101   :  { %354 = vst [vmem:[%s589_s3 + $0x20] sm:$0xff] %v338_v39  ;;  %362 = vst [vmem:[%s589_s3 + $0x60] sm:$0xff] %v346_v40  ;;  %v339_v47 = vadd.f32 %v386_v16, %v232_v45  ;;  %v347_v48 = vadd.f32 %v386_v16, %v264_v46 }
 0x102   :  { %357 = vst [vmem:[%s589_s3 + $0x38] sm:$0xff] %v341_v43  ;;  %365 = vst [vmem:[%s589_s3 + $0x78] sm:$0xff] %v349_v44 }
 0x103   :  { %355 = vst [vmem:[%s589_s3 + $0x28] sm:$0xff] %v339_v47  ;;  %363 = vst [vmem:[%s589_s3 + $0x68] sm:$0xff] %v347_v48 }

// kernel: residual_block_pallas.5
= control target key start
LH: loop header
LB: loop body
LE: loop exit
PB: predicated region body
PF: predicated region fallthrough
CT: control target
= control target key end

     0   :  { %s708_s1 = inlined_call_operand.vmem [shape: bf16[128,128], index: 1, kind: input, shape index: {}]   ;;  %s709_s0 = inlined_call_operand.vmem [shape: bf16[128,128], index: 0, kind: input, shape index: {}]   ;;  %s710_s2 = inlined_call_operand.vmem [shape: f32[1,128], index: 2, kind: input, shape index: {}]   ;;  %s711_s3 = inlined_call_operand.vmem [shape: f32[128,128], index: 3, kind: input, shape index: {}]   ;;  %s712_s4 = inlined_call_operand.vmem [shape: f32[128,128], index: 4, kind: output, shape index: {}]  }
   0x1   :  { %v502_v0 = vld [vmem:[%s708_s1] sm:$0xff]   ;;  %v503_v1 = vld [vmem:[%s708_s1 + $0x8] sm:$0xff]   ;;  %v504_v2 = vld [vmem:[%s708_s1 + $0x10] sm:$0xff]  }
   0x2   :  { %454 = vmatprep.subr.bf16.mxu0 %v502_v0  ;;  %486 = vmatprep.subr.bf16.mxu1 %v502_v0  ;;  %v505_v3 = vld [vmem:[%s708_s1 + $0x18] sm:$0xff]   ;;  %v510_v4 = vld [vmem:[%s709_s0] sm:$0xff]   ;;  %v507_v7 = vld [vmem:[%s708_s1 + $0x28] sm:$0xff]  }
   0x3   :  { %455 = vmatpush3.bf16.msra.mxu0 %v502_v0  ;;  %494 = vmatpush3.bf16.msra.mxu1 %v502_v0  ;;  %v511_v5 = vld [vmem:[%s709_s0 + $0x20] sm:$0xff]   ;;  %v508_v8 = vld [vmem:[%s708_s1 + $0x30] sm:$0xff]   ;;  %v509_v9 = vld [vmem:[%s708_s1 + $0x38] sm:$0xff]  }
   0x4   :  { %456 = vmatprep.subr.bf16.mxu0 %v503_v1  ;;  %487 = vmatprep.subr.bf16.mxu1 %v503_v1  ;;  %v506_v6 = vld [vmem:[%s708_s1 + $0x20] sm:$0xff]   ;;  %v512_v10 = vld [vmem:[%s709_s0 + $0x8] sm:$0xff]   ;;  %v514_v12 = vld [vmem:[%s709_s0 + $0x10] sm:$0xff]  }
   0x5   :  { %470 = vmatprep.mubr.bf16.mxu0 %v510_v4  ;;  %478 = vmatprep.mubr.bf16.mxu1 %v511_v5  ;;  %v513_v11 = vld [vmem:[%s709_s0 + $0x28] sm:$0xff]   ;;  %v515_v13 = vld [vmem:[%s709_s0 + $0x30] sm:$0xff]   ;;  %v516_v14 = vld [vmem:[%s709_s0 + $0x18] sm:$0xff]  }
   0x6   :  { %v517_v15 = vld [vmem:[%s709_s0 + $0x38] sm:$0xff]   ;;  %v594_v16 = vld [vmem:[%s710_s2] ss:$0 sm:$0xff]  ;;  %v355_v18 = vld [vmem:[%s711_s3 + $0x10] sm:$0xff] }
   0x7   :  { %457 = vmatpush3.bf16.msra.mxu0 %v503_v1  ;;  %495 = vmatpush3.bf16.msra.mxu1 %v503_v1  ;;  %v363_v20 = vld [vmem:[%s711_s3 + $0x50] sm:$0xff]  ;;  %v353_v24 = vld [vmem:[%s711_s3] sm:$0xff]  ;;  %v356_v30 = vld [vmem:[%s711_s3 + $0x18] sm:$0xff] }
   0x8   :  { %458 = vmatprep.subr.bf16.mxu0 %v504_v2  ;;  %488 = vmatprep.subr.bf16.mxu1 %v504_v2  ;;  %v361_v26 = vld [vmem:[%s711_s3 + $0x40] sm:$0xff]  ;;  %v364_v32 = vld [vmem:[%s711_s3 + $0x58] sm:$0xff]  ;;  %v354_v38 = vld [vmem:[%s711_s3 + $0x8] sm:$0xff] }
   0x9   :  { %v362_v40 = vld [vmem:[%s711_s3 + $0x48] sm:$0xff]  ;;  %v359_v58 = vld [vmem:[%s711_s3 + $0x30] sm:$0xff]  ;;  %v357_v0 = vld [vmem:[%s711_s3 + $0x20] sm:$0xff] }
   0xa   :  { %v367_v60 = vld [vmem:[%s711_s3 + $0x70] sm:$0xff] }
   0xb   :  { %459 = vmatpush3.bf16.msra.mxu0 %v504_v2  ;;  %496 = vmatpush3.bf16.msra.mxu1 %v504_v2  ;;  %v365_v2 = vld [vmem:[%s711_s3 + $0x60] sm:$0xff] }
   0xc   :  { %460 = vmatprep.subr.bf16.mxu0 %v505_v3  ;;  %489 = vmatprep.subr.bf16.mxu1 %v505_v3 }
   0xf   :  { %461 = vmatpush3.bf16.msra.mxu0 %v505_v3  ;;  %497 = vmatpush3.bf16.msra.mxu1 %v505_v3 }
  0x10   :  { %462 = vmatprep.subr.bf16.mxu0 %v506_v6  ;;  %490 = vmatprep.subr.bf16.mxu1 %v506_v6 }
  0x13   :  { %463 = vmatpush3.bf16.msra.mxu0 %v506_v6  ;;  %498 = vmatpush3.bf16.msra.mxu1 %v506_v6  ;;  %v360_v6 = vld [vmem:[%s711_s3 + $0x38] sm:$0xff] }
  0x14   :  { %464 = vmatprep.subr.bf16.mxu0 %v507_v7  ;;  %491 = vmatprep.subr.bf16.mxu1 %v507_v7 }
  0x17   :  { %465 = vmatpush3.bf16.msra.mxu0 %v507_v7  ;;  %499 = vmatpush3.bf16.msra.mxu1 %v507_v7 }
  0x18   :  { %466 = vmatprep.subr.bf16.mxu0 %v508_v8  ;;  %492 = vmatprep.subr.bf16.mxu1 %v508_v8 }
  0x1b   :  { %467 = vmatpush3.bf16.msra.mxu0 %v508_v8  ;;  %500 = vmatpush3.bf16.msra.mxu1 %v508_v8  ;;  %v368_v8 = vld [vmem:[%s711_s3 + $0x78] sm:$0xff] }
  0x1c   :  { %468 = vmatprep.subr.bf16.mxu0 %v509_v9  ;;  %493 = vmatprep.subr.bf16.mxu1 %v509_v9 }
  0x1f   :  { %469 = vmatpush3.bf16.msra.mxu0 %v509_v9  ;;  %501 = vmatpush3.bf16.msra.mxu1 %v509_v9 }
  0x22   :  { %471 = vmatmul.mubr.bf16.vlgmr.msra.gmra.mrb[0].mxu0 %v512_v10  ;;  %479 = vmatmul.mubr.bf16.vlgmr.msra.gmra.mrb[0].mxu1 %v513_v11 }
  0x23   :  { %474 = vmatprep.mubr.bf16.mxu0 %v514_v12  ;;  %482 = vmatprep.mubr.bf16.mxu1 %v515_v13 }
  0x2a   :  { %475 = vmatmul.mubr.bf16.gmra.mrb[4].mxu0 %v516_v14  ;;  %483 = vmatmul.mubr.bf16.gmra.mrb[4].mxu1 %v517_v15  ;;  %v358_v14 = vld [vmem:[%s711_s3 + $0x28] sm:$0xff] }
  0xf5   :  { %v472_v17 = vpop.f32.mrb[0].mxu0  ;;  %v480_v19 = vpop.f32.mrb[0].mxu1 }
  0xf6   :  { %v339_v21 = vadd.f32 %v472_v17, %v594_v16  ;;  %v347_v22 = vadd.f32 %v480_v19, %v594_v16  ;;  %v216_v23 = vpop.f32.mrb[1].mxu0  ;;  %v248_v25 = vpop.f32.mrb[1].mxu1  ;;  %v366_v17 = vld [vmem:[%s711_s3 + $0x68] sm:$0xff] }
  0xf7   :  { %v337_v27 = vadd.f32 %v594_v16, %v216_v23  ;;  %v345_v28 = vadd.f32 %v594_v16, %v248_v25  ;;  %v473_v29 = vpop.f32.mrb[2].mxu0  ;;  %v481_v31 = vpop.f32.mrb[2].mxu1 }
  0xf8   :  { %v371_v33 = vadd.f32 %v355_v18, %v339_v21  ;;  %v379_v34 = vadd.f32 %v363_v20, %v347_v22  ;;  %v340_v35 = vadd.f32 %v473_v29, %v594_v16  ;;  %v348_v36 = vadd.f32 %v481_v31, %v594_v16  ;;  %v219_v37 = vpop.f32.mrb[3].mxu0  ;;  %v251_v39 = vpop.f32.mrb[3].mxu1 }
  0xf9   :  { %v369_v41 = vadd.f32 %v353_v24, %v337_v27  ;;  %v377_v42 = vadd.f32 %v361_v26, %v345_v28  ;;  %v338_v43 = vadd.f32 %v594_v16, %v219_v37  ;;  %v346_v44 = vadd.f32 %v594_v16, %v251_v39 }
  0xfa   :  { %v387_v45 = vmax.f32 %v371_v33, 0.0  ;;  %v395_v46 = vmax.f32 %v379_v34, 0.0  ;;  %v372_v47 = vadd.f32 %v356_v30, %v340_v35  ;;  %v380_v48 = vadd.f32 %v364_v32, %v348_v36 }
  0xfb   :  { %v385_v49 = vmax.f32 %v369_v41, 0.0  ;;  %v393_v50 = vmax.f32 %v377_v42, 0.0  ;;  %v370_v51 = vadd.f32 %v354_v38, %v338_v43  ;;  %v378_v52 = vadd.f32 %v362_v40, %v346_v44 }
  0xfc   :  { %403 = vst [vmem:[%s712_s4 + $0x10] sm:$0xff] %v387_v45  ;;  %411 = vst [vmem:[%s712_s4 + $0x50] sm:$0xff] %v395_v46  ;;  %v388_v53 = vmax.f32 %v372_v47, 0.0  ;;  %v396_v54 = vmax.f32 %v380_v48, 0.0 }
  0xfd   :  { %401 = vst [vmem:[%s712_s4] sm:$0xff] %v385_v49  ;;  %409 = vst [vmem:[%s712_s4 + $0x40] sm:$0xff] %v393_v50  ;;  %v386_v55 = vmax.f32 %v370_v51, 0.0  ;;  %v394_v56 = vmax.f32 %v378_v52, 0.0  ;;  %v476_v57 = vpop.f32.mrb[4].mxu0  ;;  %v484_v59 = vpop.f32.mrb[4].mxu1 }
  0xfe   :  { %404 = vst [vmem:[%s712_s4 + $0x18] sm:$0xff] %v388_v53  ;;  %412 = vst [vmem:[%s712_s4 + $0x58] sm:$0xff] %v396_v54  ;;  %v343_v61 = vadd.f32 %v476_v57, %v594_v16  ;;  %v351_v62 = vadd.f32 %v484_v59, %v594_v16  ;;  %v232_v63 = vpop.f32.mrb[5].mxu0  ;;  %v264_v1 = vpop.f32.mrb[5].mxu1 }
  0xff   :  { %402 = vst [vmem:[%s712_s4 + $0x8] sm:$0xff] %v386_v55  ;;  %410 = vst [vmem:[%s712_s4 + $0x48] sm:$0xff] %v394_v56  ;;  %v341_v3 = vadd.f32 %v594_v16, %v232_v63  ;;  %v349_v4 = vadd.f32 %v594_v16, %v264_v1  ;;  %v477_v5 = vpop.f32.mrb[6].mxu0  ;;  %v485_v7 = vpop.f32.mrb[6].mxu1 }
 0x100   :  { %v375_v9 = vadd.f32 %v359_v58, %v343_v61  ;;  %v383_v10 = vadd.f32 %v367_v60, %v351_v62  ;;  %v344_v11 = vadd.f32 %v477_v5, %v594_v16  ;;  %v352_v12 = vadd.f32 %v485_v7, %v594_v16  ;;  %v235_v13 = vpop.f32.mrb[7].mxu0  ;;  %v267_v15 = vpop.f32.mrb[7].mxu1 }
 0x101   :  { %v373_v18 = vadd.f32 %v357_v0, %v341_v3  ;;  %v381_v19 = vadd.f32 %v365_v2, %v349_v4  ;;  %v342_v20 = vadd.f32 %v594_v16, %v235_v13  ;;  %v350_v21 = vadd.f32 %v594_v16, %v267_v15 }
 0x102   :  { %v391_v22 = vmax.f32 %v375_v9, 0.0  ;;  %v399_v23 = vmax.f32 %v383_v10, 0.0  ;;  %v376_v24 = vadd.f32 %v360_v6, %v344_v11  ;;  %v384_v25 = vadd.f32 %v368_v8, %v352_v12 }
 0x103   :  { %v389_v26 = vmax.f32 %v373_v18, 0.0  ;;  %v397_v27 = vmax.f32 %v381_v19, 0.0  ;;  %v374_v28 = vadd.f32 %v358_v14, %v342_v20  ;;  %v382_v29 = vadd.f32 %v366_v17, %v350_v21 }
 0x104   :  { %407 = vst [vmem:[%s712_s4 + $0x30] sm:$0xff] %v391_v22  ;;  %415 = vst [vmem:[%s712_s4 + $0x70] sm:$0xff] %v399_v23  ;;  %v392_v30 = vmax.f32 %v376_v24, 0.0  ;;  %v400_v31 = vmax.f32 %v384_v25, 0.0 }
 0x105   :  { %405 = vst [vmem:[%s712_s4 + $0x20] sm:$0xff] %v389_v26  ;;  %413 = vst [vmem:[%s712_s4 + $0x60] sm:$0xff] %v397_v27  ;;  %v390_v16 = vmax.f32 %v374_v28, 0.0  ;;  %v398_v32 = vmax.f32 %v382_v29, 0.0 }
 0x106   :  { %408 = vst [vmem:[%s712_s4 + $0x38] sm:$0xff] %v392_v30  ;;  %416 = vst [vmem:[%s712_s4 + $0x78] sm:$0xff] %v400_v31 }
 0x107   :  { %406 = vst [vmem:[%s712_s4 + $0x28] sm:$0xff] %v390_v16  ;;  %414 = vst [vmem:[%s712_s4 + $0x68] sm:$0xff] %v398_v32 }

</bundles_post_ra>
